<compile_context>
chip_gen: v7x
topology: tpu7x:2x2x1
jax: 0.10.0
libtpu: 0.0.40
codegen_flags: <defaults>
</compile_context>

<pallas_src>
import functools

import jax
import jax.numpy as jnp
from jax.experimental import pallas as pl
from jax.experimental.pallas import tpu as pltpu

_MIB = 1024 * 1024


def _simam_kernel(x_ref, o_ref, *, inv_hw, coef, const, tail_dtype):
    # x_ref block: (row_tile, HW) — each row is one (b, c) channel map.
    x = x_ref[...]
    xf = x.astype(jnp.float32)

    # One pass over the block: fused sum(x) and sum(x*x), accumulated in f32.
    sum_x = jnp.sum(xf, axis=-1, keepdims=True)            # (rows, 1)
    sum_xx = jnp.sum(xf * xf, axis=-1, keepdims=True)      # (rows, 1)
    mu = sum_x * inv_hw                                     # mean
    # s = sum((x - mu)^2) = sum(x^2) - sum(x)^2/hw; clamp cancellation noise.
    s = jnp.maximum(sum_xx - sum_x * mu, 0.0)

    # y = d / (4*(s/n + e_lambda)) + 0.5  ==  d * 1/(s*(4/n) + 4*e_lambda) + 0.5
    # One per-row reciprocal instead of a full-block divide.
    inv = pl.reciprocal(s * coef + const, approx=False)     # (rows, 1) f32

    # Elementwise tail (bf16 on v6e/v7x for bf16 inputs, else f32).
    xt = x.astype(tail_dtype)
    xm = xt - mu.astype(tail_dtype)
    d = xm * xm
    y = d * inv.astype(tail_dtype) + 0.5
    o_ref[...] = (xt * jax.nn.sigmoid(y)).astype(o_ref.dtype)


def _vmem_capacity_bytes():
    try:
        return int(pltpu.get_tpu_info().vmem_capacity_bytes)
    except Exception:
        return 64 * _MIB  # conservative (v7x-sized) fallback


def _bf16_tail_ok():
    """bf16 VPU/EUP exists on v6e and newer; keep f32 tail elsewhere."""
    try:
        kind = jax.devices()[0].device_kind.lower()
    except Exception:
        return False
    return ("v6" in kind) or ("v7" in kind) or ("7x" in kind)


def _choose_row_tile(bc, hw, dtype_bytes, sublane, target_block_bytes):
    """Sublane-aligned row tile targeting ~1-4 MiB blocks, capped so the grid
    gets >= ~8 steps when bc allows (pipelining + both v7x TensorCores)."""
    row_bytes = max(1, hw * dtype_bytes)
    max_rows = max(1, target_block_bytes // row_bytes)
    rt = max(sublane, (max_rows // sublane) * sublane)
    if bc >= 8 * sublane:
        cap = max(sublane, (bc // 8) // sublane * sublane)
        rt = min(rt, cap)
    return min(rt, bc)


def simam(x, e_lambda=1e-4, row_tile=None):
    """SimAM forward. x: (B, C, H, W). Returns same shape/dtype."""
    b, c, h, w = x.shape
    hw = h * w
    n = hw - 1
    if n <= 0:
        # Matches PyTorch semantics only for h*w >= 2 (n = h*w - 1 > 0).
        raise ValueError("SimAM requires h*w >= 2.")
    bc = b * c
    x2d = x.reshape(bc, hw)

    dtype_bytes = jnp.dtype(x.dtype).itemsize
    sublane = {4: 8, 2: 16, 1: 32}.get(dtype_bytes, 8)

    # VMEM budget: 2 arrays x 2 buffers x block + ~2 full-block f32 temps.
    vmem_cap = _vmem_capacity_bytes()
    vmem_limit = min(vmem_cap * 3 // 4, 64 * _MIB)   # ~48 MiB v7x, 64 MiB v5e/v6e
    target_block_bytes = max(_MIB, min(4 * _MIB, vmem_limit // 12))

    if row_tile is None:
        row_tile = _choose_row_tile(bc, hw, dtype_bytes, sublane,
                                    target_block_bytes)
    else:
        row_tile = int(row_tile)
        if row_tile < 1:
            raise ValueError("row_tile must be >= 1")
        if row_tile < bc and row_tile % 8 != 0:
            # Keep the block's sublane dim legal ((8,128) constraint).
            row_tile = ((row_tile + 7) // 8) * 8
    row_tile = min(row_tile, bc)

    grid = (pl.cdiv(bc, row_tile),)  # ragged last block allowed; writes masked

    tail_dtype = (x.dtype if (x.dtype == jnp.bfloat16 and _bf16_tail_ok())
                  else jnp.float32)

    kernel = functools.partial(
        _simam_kernel,
        inv_hw=1.0 / float(hw),
        coef=4.0 / float(n),
        const=4.0 * float(e_lambda),
        tail_dtype=tail_dtype,
    )

    out2d = pl.pallas_call(
        kernel,
        out_shape=jax.ShapeDtypeStruct((bc, hw), x.dtype),
        grid=grid,
        in_specs=[pl.BlockSpec((row_tile, hw), lambda i: (i, 0))],
        out_specs=pl.BlockSpec((row_tile, hw), lambda i: (i, 0)),
        compiler_params=pltpu.CompilerParams(
            dimension_semantics=("parallel",),
            vmem_limit_bytes=int(vmem_limit),
        ),
    )(x2d)

    return out2d.reshape(b, c, h, w)


def simam_reference(x, e_lambda=1e-4):
    b, c, h, w = x.shape
    n = w * h - 1
    mu = jnp.mean(x, axis=(2, 3), keepdims=True)
    d = (x - mu) ** 2
    s = jnp.sum(d, axis=(2, 3), keepdims=True)
    y = d / (4.0 * (s / n + e_lambda)) + 0.5
    return x * jax.nn.sigmoid(y)


if __name__ == "__main__":
    key = jax.random.PRNGKey(0)
    B, C, H, W = 2, 4, 16, 16
    x = jax.random.normal(key, (B, C, H, W), dtype=jnp.float32)

    out = jax.block_until_ready(simam(x))
    ref = simam_reference(x)
    assert out.shape == (B, C, H, W)
    assert jnp.allclose(out, ref, atol=1e-5, rtol=1e-5)

    # Multi-step pipelined grid (bc=32, row_tile=8 -> 4 grid steps).
    x2 = jax.random.normal(jax.random.PRNGKey(1), (2, 16, 16, 16),
                           dtype=jnp.float32)
    out2 = jax.block_until_ready(simam(x2, row_tile=8))
    assert jnp.allclose(out2, simam_reference(x2), atol=1e-5, rtol=1e-5)

    # Ragged last block (bc=40, row_tile=16 -> grid=3, last block half-valid).
    x3 = jax.random.normal(jax.random.PRNGKey(2), (2, 20, 16, 16),
                           dtype=jnp.float32)
    out3 = jax.block_until_ready(simam(x3, row_tile=16))
    assert jnp.allclose(out3, simam_reference(x3), atol=1e-5, rtol=1e-5)

    # Small spatial map (7x7 -> hw=49, masked lanes in reductions/stores).
    x4 = jax.random.normal(jax.random.PRNGKey(3), (2, 8, 7, 7),
                           dtype=jnp.float32)
    out4 = jax.block_until_ready(simam(x4))
    assert jnp.allclose(out4, simam_reference(x4), atol=1e-5, rtol=1e-5)

    print("KERNEL_OK")
</pallas_src>

<mosaic_0001>
module attributes {stable_mosaic.version = 11 : i64} {
  func.func @_simam_kernel(%arg0: i32, %arg1: memref<8x256xf32, #tpu.memory_space<vmem>>, %arg2: memref<8x256xf32, #tpu.memory_space<vmem>>) attributes {dimension_semantics = [#tpu.dimension_semantics<parallel>], iteration_bounds = array<i64: 1>, scalar_prefetch = 0 : i64, scratch_operands = 0 : i64, tpu.core_type = #tpu.core_type<tc>, window_params = [{transform_indices = @transform_0, window_bounds = array<i64: 8, 256>}, {transform_indices = @transform_1, window_bounds = array<i64: 8, 256>}]} {
    %c0 = arith.constant 0 : index
    %c0_0 = arith.constant 0 : index
    %0 = vector.load %arg1[%c0, %c0_0] : memref<8x256xf32, #tpu.memory_space<vmem>>, vector<8x256xf32>
    %cst = arith.constant dense<0.000000e+00> : vector<8xf32>
    %1 = vector.multi_reduction <add>, %0, %cst [1] : vector<8x256xf32> to vector<8xf32>
    %2 = vector.shape_cast %1 : vector<8xf32> to vector<8x1xf32>
    %3 = arith.mulf %0, %0 : vector<8x256xf32>
    %cst_1 = arith.constant dense<0.000000e+00> : vector<8xf32>
    %4 = vector.multi_reduction <add>, %3, %cst_1 [1] : vector<8x256xf32> to vector<8xf32>
    %5 = vector.shape_cast %4 : vector<8xf32> to vector<8x1xf32>
    %cst_2 = arith.constant 3.906250e-03 : f32
    %6 = vector.broadcast %cst_2 : f32 to vector<8x1xf32>
    %7 = arith.mulf %2, %6 : vector<8x1xf32>
    %8 = arith.mulf %2, %7 : vector<8x1xf32>
    %9 = arith.subf %5, %8 : vector<8x1xf32>
    %cst_3 = arith.constant 0.000000e+00 : f32
    %10 = vector.broadcast %cst_3 : f32 to vector<8x1xf32>
    %11 = arith.maximumf %9, %10 : vector<8x1xf32>
    %cst_4 = arith.constant 0.0156862754 : f32
    %12 = vector.broadcast %cst_4 : f32 to vector<8x1xf32>
    %13 = arith.mulf %11, %12 : vector<8x1xf32>
    %cst_5 = arith.constant 4.000000e-04 : f32
    %14 = vector.broadcast %cst_5 : f32 to vector<8x1xf32>
    %15 = arith.addf %13, %14 : vector<8x1xf32>
    %16 = tpu.reciprocal %15 : vector<8x1xf32> -> vector<8x1xf32>
    %17 = vector.broadcast %7 : vector<8x1xf32> to vector<8x256xf32>
    %18 = arith.subf %0, %17 : vector<8x256xf32>
    %19 = arith.mulf %18, %18 : vector<8x256xf32>
    %20 = vector.broadcast %16 : vector<8x1xf32> to vector<8x256xf32>
    %21 = arith.mulf %19, %20 : vector<8x256xf32>
    %cst_6 = arith.constant 5.000000e-01 : f32
    %22 = vector.broadcast %cst_6 : f32 to vector<8x256xf32>
    %23 = arith.addf %21, %22 : vector<8x256xf32>
    %24 = arith.negf %23 : vector<8x256xf32>
    %25 = math.exp %24 : vector<8x256xf32>
    %cst_7 = arith.constant 1.000000e+00 : f32
    %26 = vector.broadcast %cst_7 : f32 to vector<8x256xf32>
    %27 = arith.addf %26, %25 : vector<8x256xf32>
    %28 = arith.divf %26, %27 : vector<8x256xf32>
    %29 = arith.mulf %0, %28 : vector<8x256xf32>
    %c0_8 = arith.constant 0 : index
    %c0_9 = arith.constant 0 : index
    %30 = vector.load %arg2[%c0_8, %c0_9] : memref<8x256xf32, #tpu.memory_space<vmem>>, vector<8x256xf32>
    tpu.vector_store %arg2[%c0_8, %c0_9], %29 {strides = array<i32>} : memref<8x256xf32, #tpu.memory_space<vmem>>, vector<8x256xf32>,
    return
  }
  func.func @transform_0(%arg0: i32) -> (i32, i32) {
    %c0_i32 = arith.constant 0 : i32
    %c0_i32_0 = arith.constant 0 : i32
    return %arg0, %c0_i32 : i32, i32
  }
  func.func @transform_1(%arg0: i32) -> (i32, i32) {
    %c0_i32 = arith.constant 0 : i32
    %c0_i32_0 = arith.constant 0 : i32
    return %arg0, %c0_i32 : i32, i32
  }
}

</mosaic_0001>

<bundles_post_ra>
// kernel: tpu_custom_call.1
= control target key start
LH: loop header
LB: loop body
LE: loop exit
PB: predicated region body
PF: predicated region fallthrough
CT: control target
= control target key end

     0   :  { %6 = vsyncpa [#allocation3], 0  ;;  %s175_s0 = inlined_call_operand.hbm [shape: f32[8,256], index: 0, kind: input, shape index: {}]   ;;  %s176_s1 = inlined_call_operand.hbm [shape: f32[8,256], index: 1, kind: output, shape index: {}]  }
   0x1   :  { %7 = vsyncpa [#allocation4], 0  ;;  %s139_s6 = smov [#allocation2]   ;;  %s91_s10 = scalar_lea.hbm %s175_s0, 256 }
   0x2   :  { %s14_s7 = sshll.u32 %s139_s6, 4  ;;  %p92_p0 = scmp.ne.s32.totalorder %s175_s0, %s91_s10  ;;  %s15_s7 = int_to_ptr.vmem [resolvable:$true] %s14_s7 }
   0x3   :  { %p95_p1 = scmp.lt.u32.totalorder %s91_s10, %s175_s0 }
   0x5   :  { %p97_p2 = pnand %p95_p1, %p92_p0 }
   0x7   :  { %100 = shalt.err (!%p97_p2)
}
   0x8   :  { %s101_s15 = scalar_lea.vmem %s15_s7, 256  ;;  %p106_p4 = scmp.lt.s32.totalorder %s15_s7, %s15_s7 }
   0x9   :  { %p102_p3 = scmp.ne.s32.totalorder %s15_s7, %s101_s15  ;;  %p107_p5 = scmp.lt.s32.totalorder %s101_s15, %s101_s15 }
   0xb   :  { %p108_p6 = por %p107_p5, %p106_p4 }
   0xd   :  { %p109_p7 = pnand %p108_p6, %p102_p3 }
   0xf   :  { %112 = shalt.err (!%p109_p7)
}
  0x10   :  { %17 = dma.hbm_to_vmem [thread:$0]  %s175_s0, 256, %s15_s7, [#allocation3]  }
  0x11   :  { %135 = dma.done.wait [#allocation3], 256  }
  0x12   :  { %136 = vsyncadd [#allocation3], 4294967040  ;;  %v21_v0 = vld [vmem:[#allocation2] sm:$0xff]  ;;  %v22_v1 = vld [vmem:[#allocation2 + $0x8] sm:$0xff]  ;;  %s140_s0 = smov [#allocation5]  }
  0x13   :  { %v23_v2 = vadd.f32 %v22_v1, %v21_v0  ;;  %v26_v3 = vmul.f32 %v21_v0, %v21_v0  ;;  %v27_v4 = vmul.f32 %v22_v1, %v22_v1  ;;  %s68_s18 = sshll.u32 %s140_s0, 4  ;;  %s69_s18 = int_to_ptr.vmem [resolvable:$true] %s68_s18 }
  0x14   :  { %s113_s19 = scalar_lea.vmem %s69_s18, 256  ;;  %p118_p9 = scmp.lt.s32.totalorder %s69_s18, %s69_s18 }
  0x15   :  { %24 = vadd.xlane.f32.xlu0 %v23_v2  ;;  %v28_v5 = vadd.f32 %v27_v4, %v26_v3  ;;  %p114_p8 = scmp.ne.s32.totalorder %s69_s18, %s113_s19  ;;  %p119_p10 = scmp.lt.s32.totalorder %s113_s19, %s113_s19 }
  0x17   :  { %p120_p11 = por %p119_p10, %p118_p9 }
  0x19   :  { %29 = vadd.xlane.f32.xlu0 %v28_v5  ;;  %p121_p12 = pnand %p120_p11, %p114_p8 }
  0xa2   :  { %v25_v6 = vpop.xlane.xlu0 %24 }
  0xa3   :  { %v31_v7 = vmul.f32 0.00390625, %v25_v6 }
  0xa5   :  { %v32_v8 = vmul.f32 %v31_v7, %v25_v6  ;;  %v38_v14 = vsub.f32 %v21_v0, %v31_v7  ;;  %v39_v15 = vsub.f32 %v22_v1, %v31_v7 }
  0xa6   :  { %v30_v9 = vpop.xlane.xlu0 %29 }
  0xa7   :  { %v33_v10 = vsub.f32 %v30_v9, %v32_v8  ;;  %v40_v16 = vmul.f32 %v38_v14, %v38_v14  ;;  %v41_v17 = vmul.f32 %v39_v15, %v39_v15 }
  0xa9   :  { %v34_v11 = vmax.f32 %v33_v10, 0.0 }
  0xab   :  { %v35_v12 = vmul.f32 0.015686275, %v34_v11 }
  0xad   :  { %v36_v13 = vadd.f32 0.0004, %v35_v12 }
  0xaf   :  { %81 = vrcp.f32 %v36_v13 }
  0xb9   :  { %v82_v18 = vpop.eup %81 }
  0xba   :  { %v42_v19 = vmul.f32 %v82_v18, %v40_v16  ;;  %v43_v20 = vmul.f32 %v82_v18, %v41_v17 }
  0xbc   :  { %v44_v21 = vadd.f32 0.5, %v42_v19  ;;  %v45_v22 = vadd.f32 0.5, %v43_v20 }
  0xbe   :  { %v77_v23 = vmul.f32 -1.442695, %v44_v21  ;;  %v78_v24 = vmul.f32 -1.442695, %v45_v22 }
  0xc0   :  { %83 = vpow2.f32 %v77_v23 }
  0xc1   :  { %85 = vpow2.f32 %v78_v24 }
  0xca   :  { %v84_v25 = vpop.eup %83 }
  0xcb   :  { %v86_v26 = vpop.eup %85  ;;  %v52_v27 = vadd.f32 1.0, %v84_v25 }
  0xcc   :  { %v53_v28 = vadd.f32 1.0, %v86_v26 }
  0xcd   :  { %87 = vrcp.f32 %v52_v27 }
  0xce   :  { %89 = vrcp.f32 %v53_v28 }
  0xd7   :  { %v88_v29 = vpop.eup %87 }
  0xd8   :  { %v90_v30 = vpop.eup %89  ;;  %v58_v31 = vmul.f32 %v88_v29, %v21_v0 }
  0xd9   :  { %v59_v32 = vmul.f32 %v90_v30, %v22_v1 }
  0xda   :  { %60 = vst [vmem:[#allocation5] sm:$0xff] %v58_v31 }
  0xdb   :  { %61 = vst [vmem:[#allocation5 + $0x8] sm:$0xff] %v59_v32 }
  0xdc   :  { %124 = shalt.err (!%p121_p12)
}
  0xdd   :  { %s125_s22 = scalar_lea.hbm %s176_s1, 256 }
  0xde   :  { %p126_p13 = scmp.ne.s32.totalorder %s176_s1, %s125_s22  ;;  %p129_p0 = scmp.lt.u32.totalorder %s125_s22, %s176_s1 }
  0xe0   :  { %p131_p1 = pnand %p129_p0, %p126_p13 }
  0xe2   :  { %134 = shalt.err (!%p131_p1)
}
  0xe3   :  { %71 = dma.vmem_to_hbm [thread:$0]  %s69_s18, 256, %s176_s1, [#allocation4]  }
  0xe4   :  { %137 = dma.done.wait [#allocation4], 256  }
  0xe5   :  { %138 = vsyncadd [#allocation4], 4294967040 }
  0xe6   :  { %75 = vsyncpa [#allocation3], 1 }
  0xe7   :  { %76 = vsyncpa [#allocation4], 1 }

</bundles_post_ra>
